<compile_context>
chip_gen: v6e
topology: v6e:2x2x1
jax: 0.10.0
libtpu: 0.0.40
codegen_flags: <defaults>
</compile_context>

<pallas_src>
import functools
import math

import numpy as np

import jax
import jax.numpy as jnp
from jax.experimental import pallas as pl
from jax.experimental.pallas import tpu as pltpu


def _rep_lanes(x, n):
    """x is (rows, 128) with the value replicated across lanes; return something
    broadcastable against (rows, n) without masked/partial-lane layouts."""
    m = x.shape[-1]
    if n == m:
        return x
    if n % m == 0:
        return jnp.tile(x, (1, n // m))   # copies of an already-replicated vreg
    return x[:, :1]                       # (rows, 1) column; jnp broadcasts it


def _flash_sdpa_kernel(scale_log2e, dropout_p, seq_q, seq_k, mxu_dtype, precision,
                       seed_ref, q_ref, k_ref, v_ref, o_ref,
                       q_sc, m_sc, l_sc, acc_sc):
    # All grid queries at the kernel top level (NOT inside pl.when bodies).
    b = pl.program_id(0)
    qi = pl.program_id(1)
    ki = pl.program_id(2)
    nk = pl.num_programs(2)

    tq, d = acc_sc.shape

    @pl.when(ki == 0)
    def _init():
        m_sc[...] = jnp.full_like(m_sc, -jnp.inf)
        l_sc[...] = jnp.zeros_like(l_sc)
        acc_sc[...] = jnp.zeros_like(acc_sc)
        # Hoisted out of the kv loop: fold scale (= S, like torch's qk.shape[-1])
        # and log2(e) into q once per (b, q-tile). Multiply in f32, then cast.
        q_sc[...] = (q_ref[0].astype(jnp.float32)
                     * jnp.float32(scale_log2e)).astype(q_sc.dtype)

    # s = (scale*log2e * q) @ k^T as a transposed contraction (MXU consumes it
    # directly, no XLU transpose of the K tile). Scores live in the log2 domain.
    s = jax.lax.dot_general(
        q_sc[...], k_ref[0].astype(mxu_dtype),
        dimension_numbers=(((1,), (1,)), ((), ())),
        preferred_element_type=jnp.float32,
        precision=precision)                           # (tq, tk) f32
    tk = s.shape[-1]

    # Online softmax (base 2). Stats are lane-replicated at (tq, 128) so every
    # scratch store is a full, unmasked vreg store.
    m_prev = m_sc[...]                                 # (tq, 128)
    l_prev = l_sc[...]                                 # (tq, 128)
    m_curr = jnp.max(s, axis=-1, keepdims=True)        # (tq, 1)
    m_next = jnp.maximum(m_prev, m_curr)               # (tq, 128), replicated
    alpha = jnp.exp2(m_prev - m_next)                  # (tq, 128)
    probs = jnp.exp2(s - _rep_lanes(m_next, tk))       # (tq, tk)
    l_sc[...] = alpha * l_prev + jnp.sum(probs, axis=-1, keepdims=True)
    m_sc[...] = m_next

    if 0.0 < dropout_p < 1.0:
        # Dropout on the (unnormalized) probabilities. Counter-based hash RNG
        # (adds/xors/shifts only) so it lowers on any backend.
        # TODO(synk): distributional match to torch's dropout, not bit-identical.
        thresh = min(int(round(dropout_p * 4294967296.0)), 0xFFFFFFFF)
        rows = jax.lax.broadcasted_iota(jnp.int32, probs.shape, 0) + qi * tq
        cols = jax.lax.broadcasted_iota(jnp.int32, probs.shape, 1) + ki * tk
        x = ((b * seq_q + rows) * seq_k + cols).astype(jnp.uint32)
        x = x + (seed_ref[0].astype(jnp.uint32) ^ jnp.uint32(0x9E3779B9))
        x = x + (x << 10)
        x = x ^ (x >> 6)
        x = x + (x << 3)
        x = x ^ (x >> 11)
        x = x + (x << 15)
        x = x ^ (x >> 16)
        probs = jnp.where(x >= jnp.uint32(thresh), probs, 0.0)

    pv = jnp.dot(probs.astype(mxu_dtype), v_ref[0].astype(mxu_dtype),
                 preferred_element_type=jnp.float32,
                 precision=precision)                  # (tq, D) f32
    acc_sc[...] = acc_sc[...] * _rep_lanes(alpha, d) + pv

    @pl.when(ki == nk - 1)
    def _finalize():
        inv = 1.0 / l_sc[...]                          # exact; (tq,128) op, negligible
        if 0.0 < dropout_p < 1.0:
            inv = inv * jnp.float32(1.0 / (1.0 - dropout_p))
        o_ref[0] = (acc_sc[...] * _rep_lanes(inv, d)).astype(o_ref.dtype)


def _pick_tile(dim, target, align):
    """Largest multiple of `align` that divides `dim` and is <= target; if `dim`
    itself is <= target, use the full dim (full-extent blocks are always legal)."""
    if dim <= target:
        return dim
    t = (min(target, dim) // align) * align
    while t >= align:
        if dim % t == 0:
            return t
        t -= align
    # TODO(synk): pad/mask ragged L or S instead of falling back to a full-dim
    # tile; the fallback is guarded by the VMEM estimate in sdpa_pallas.
    return dim


def _reference_no_dropout(q, k, v):
    """Pure-JAX reference for the torch module with p = 0 (f32 semantics)."""
    hp = jax.lax.Precision.HIGHEST
    qk = jnp.einsum("bld,bsd->bls", q, k, precision=hp)
    scaled = qk * jnp.float32(qk.shape[-1])
    probs = jax.nn.softmax(scaled, axis=-1)
    return jnp.einsum("bls,bsd->bld", probs, v, precision=hp)


def sdpa_pallas(q, k, v, dropout_p, seed=0, tq_target=256, tk_target=1024,
                mxu_dtype=None):
    """Returns (q, k, v, dropout_p, output) exactly like the torch module.

    mxu_dtype=None keeps the input precision (f32 math, like torch);
    mxu_dtype=jnp.bfloat16 feeds bf16 operands to the MXU (v6e/v7x fast path,
    f32 accumulation).
    """
    B, L, D = q.shape
    _, S, _ = k.shape
    assert k.shape == (B, S, D) and v.shape == (B, S, D)
    p_static = float(dropout_p)

    if p_static >= 1.0:
        # torch F.dropout(p=1) zeroes everything -> output identically zero.
        # Constant fill in the wrapper: no kernel launch, no K/V HBM traffic.
        return (q, k, v, dropout_p, jnp.zeros((B, L, D), q.dtype))

    if mxu_dtype is None:
        mxu_dtype = q.dtype
    mxu_dtype = np.dtype(mxu_dtype)
    precision = (jax.lax.Precision.HIGHEST if mxu_dtype == np.dtype(np.float32)
                 else jax.lax.Precision.DEFAULT)

    # Tiling: tq sublane-aligned (8), tk lane/MXU-aligned (128, prefer big).
    tq = _pick_tile(L, tq_target, 8)
    tk = _pick_tile(S, tk_target, 128)
    nq, nk = L // tq, S // tk

    # Resident-VMEM sanity guard (v7x has only 64 MiB; default scoped limit 32 MiB).
    in_bytes = q.dtype.itemsize
    vmem_est = (2 * (2 * tq * D + 2 * tk * D) * in_bytes       # dbl-buffered q,o,k,v blocks
                + tq * D * mxu_dtype.itemsize                  # hoisted scaled-q scratch
                + (2 * tq * 128 + tq * D) * 4)                 # m, l, acc f32 scratch
    assert vmem_est <= 40 * 1024 * 1024, (
        f"tiles (tq={tq}, tk={tk}, D={D}) need ~{vmem_est >> 20} MiB VMEM; "
        "reduce tq_target/tk_target or pad L/S to tileable sizes")

    scale_log2e = float(S) * math.log2(math.e)
    seed_arr = jnp.asarray([int(seed)], dtype=jnp.int32)
    kernel = functools.partial(_flash_sdpa_kernel, scale_log2e, p_static,
                               L, S, mxu_dtype, precision)

    out = pl.pallas_call(
        kernel,
        out_shape=jax.ShapeDtypeStruct((B, L, D), q.dtype),
        grid_spec=pltpu.PrefetchScalarGridSpec(
            num_scalar_prefetch=1,
            grid=(B, nq, nk),
            in_specs=[
                pl.BlockSpec((1, tq, D), lambda b, qi, ki, seed: (b, qi, 0)),
                pl.BlockSpec((1, tk, D), lambda b, qi, ki, seed: (b, ki, 0)),
                pl.BlockSpec((1, tk, D), lambda b, qi, ki, seed: (b, ki, 0)),
            ],
            out_specs=pl.BlockSpec((1, tq, D), lambda b, qi, ki, seed: (b, qi, 0)),
            scratch_shapes=[
                pltpu.VMEM((tq, D), mxu_dtype),       # scale*log2e*q (hoisted)
                pltpu.VMEM((tq, 128), jnp.float32),   # running max m (lane-replicated)
                pltpu.VMEM((tq, 128), jnp.float32),   # running denom l (lane-replicated)
                pltpu.VMEM((tq, D), jnp.float32),     # output accumulator
            ],
        ),
        compiler_params=pltpu.CompilerParams(
            dimension_semantics=("parallel", "parallel", "arbitrary"),
        ),
    )(seed_arr, q, k, v)

    return (q, k, v, dropout_p, out)


if __name__ == "__main__":
    # Small, consistent SDPA shapes (the original torch script's literal shapes
    # are inconsistent and its forward would not run with them).
    B, L, S, D = 2, 8, 16, 32
    key = jax.random.PRNGKey(0)
    kq, kk, kv = jax.random.split(key, 3)
    q = 0.25 * jax.random.normal(kq, (B, L, D), dtype=jnp.float32)
    k = 0.25 * jax.random.normal(kk, (B, S, D), dtype=jnp.float32)
    v = jax.random.normal(kv, (B, S, D), dtype=jnp.float32)

    # Module's configuration: dropout_p = 1  -> dropout zeroes everything.
    q_o, k_o, v_o, p_o, out1 = sdpa_pallas(q, k, v, 1)
    jax.block_until_ready(out1)
    assert out1.shape == (B, L, D)
    assert bool(jnp.all(out1 == 0.0))

    # p = 0: exact SDPA, compare against the pure-JAX (f32) reference.
    *_, out0 = sdpa_pallas(q, k, v, 0.0)
    jax.block_until_ready(out0)
    ref0 = _reference_no_dropout(q, k, v)
    assert bool(jnp.allclose(out0, ref0, atol=2e-3, rtol=2e-3))

    # 0 < p < 1: dropout branch (hash RNG -> distributional match to torch only).
    *_, outd = sdpa_pallas(q, k, v, 0.5, seed=7)
    jax.block_until_ready(outd)
    assert outd.shape == (B, L, D)
    assert bool(jnp.all(jnp.isfinite(outd)))
    assert not bool(jnp.allclose(outd, out0))   # the mask actually did something

    # Multi-tile flash path: several q and kv tiles with online softmax.
    B2, L2, S2, D2 = 2, 256, 512, 128
    kq2, kk2, kv2 = jax.random.split(jax.random.PRNGKey(1), 3)
    q2 = 0.02 * jax.random.normal(kq2, (B2, L2, D2), dtype=jnp.float32)
    k2 = 0.02 * jax.random.normal(kk2, (B2, S2, D2), dtype=jnp.float32)
    v2 = jax.random.normal(kv2, (B2, S2, D2), dtype=jnp.float32)
    *_, out2 = sdpa_pallas(q2, k2, v2, 0.0, tq_target=128, tk_target=256)
    jax.block_until_ready(out2)
    ref2 = _reference_no_dropout(q2, k2, v2)
    assert bool(jnp.allclose(out2, ref2, atol=2e-3, rtol=2e-3))

    # bf16-MXU fast path (v6e/v7x): same math, bf16 operands, f32 accumulation.
    *_, out2b = sdpa_pallas(q2, k2, v2, 0.0, tq_target=128, tk_target=256,
                            mxu_dtype=jnp.bfloat16)
    jax.block_until_ready(out2b)
    assert bool(jnp.allclose(out2b, ref2, atol=6e-2, rtol=6e-2))

    print("KERNEL_OK")
</pallas_src>

<mosaic_0001>
module attributes {stable_mosaic.version = 11 : i64} {
  func.func @_flash_sdpa_kernel(%arg0: i32, %arg1: i32, %arg2: i32, %arg3: memref<1xi32, #tpu.memory_space<smem>>, %arg4: memref<1x8x32xf32, #tpu.memory_space<vmem>>, %arg5: memref<1x16x32xf32, #tpu.memory_space<vmem>>, %arg6: memref<1x16x32xf32, #tpu.memory_space<vmem>>, %arg7: memref<1x8x32xf32, #tpu.memory_space<vmem>>, %arg8: memref<8x32xf32, #tpu.memory_space<vmem>>, %arg9: memref<8x128xf32, #tpu.memory_space<vmem>>, %arg10: memref<8x128xf32, #tpu.memory_space<vmem>>, %arg11: memref<8x32xf32, #tpu.memory_space<vmem>>) attributes {dimension_semantics = [#tpu.dimension_semantics<parallel>, #tpu.dimension_semantics<parallel>, #tpu.dimension_semantics<arbitrary>], iteration_bounds = array<i64: 2, 1, 1>, scalar_prefetch = 1 : i64, scratch_operands = 4 : i64, tpu.core_type = #tpu.core_type<tc>, window_params = [{transform_indices = @transform_0, window_bounds = array<i64: 1, 8, 32>}, {transform_indices = @transform_1, window_bounds = array<i64: 1, 16, 32>}, {transform_indices = @transform_2, window_bounds = array<i64: 1, 16, 32>}, {transform_indices = @transform_3, window_bounds = array<i64: 1, 8, 32>}]} {
    %c0_i32 = arith.constant 0 : i32
    %0 = arith.cmpi eq, %arg2, %c0_i32 : i32
    %1 = arith.extui %0 : i1 to i32
    %c0_i32_0 = arith.constant 0 : i32
    %2 = arith.cmpi ne, %1, %c0_i32_0 : i32
    scf.if %2 {
      %cst_25 = arith.constant 0xFF800000 : f32
      %38 = vector.broadcast %cst_25 : f32 to vector<8x128xf32>
      %c0_26 = arith.constant 0 : index
      %c0_27 = arith.constant 0 : index
      %39 = vector.load %arg9[%c0_26, %c0_27] : memref<8x128xf32, #tpu.memory_space<vmem>>, vector<8x128xf32>
      tpu.vector_store %arg9[%c0_26, %c0_27], %38 {strides = array<i32>} : memref<8x128xf32, #tpu.memory_space<vmem>>, vector<8x128xf32>,
      %cst_28 = arith.constant 0.000000e+00 : f32
      %40 = vector.broadcast %cst_28 : f32 to vector<8x128xf32>
      %c0_29 = arith.constant 0 : index
      %c0_30 = arith.constant 0 : index
      %41 = vector.load %arg10[%c0_29, %c0_30] : memref<8x128xf32, #tpu.memory_space<vmem>>, vector<8x128xf32>
      tpu.vector_store %arg10[%c0_29, %c0_30], %40 {strides = array<i32>} : memref<8x128xf32, #tpu.memory_space<vmem>>, vector<8x128xf32>,
      %cst_31 = arith.constant 0.000000e+00 : f32
      %42 = vector.broadcast %cst_31 : f32 to vector<8x32xf32>
      %c0_32 = arith.constant 0 : index
      %c0_33 = arith.constant 0 : index
      %43 = vector.load %arg11[%c0_32, %c0_33] : memref<8x32xf32, #tpu.memory_space<vmem>>, vector<8x32xf32>
      tpu.vector_store %arg11[%c0_32, %c0_33], %42 {strides = array<i32>} : memref<8x32xf32, #tpu.memory_space<vmem>>, vector<8x32xf32>,
      %c0_34 = arith.constant 0 : index
      %c0_35 = arith.constant 0 : index
      %c0_36 = arith.constant 0 : index
      %44 = vector.load %arg4[%c0_34, %c0_35, %c0_36] : memref<1x8x32xf32, #tpu.memory_space<vmem>>, vector<1x8x32xf32>
      %45 = vector.shape_cast %44 : vector<1x8x32xf32> to vector<8x32xf32>
      %cst_37 = arith.constant 23.0831203 : f32
      %46 = vector.broadcast %cst_37 : f32 to vector<8x32xf32>
      %47 = arith.mulf %45, %46 : vector<8x32xf32>
      %c0_38 = arith.constant 0 : index
      %c0_39 = arith.constant 0 : index
      %48 = vector.load %arg8[%c0_38, %c0_39] : memref<8x32xf32, #tpu.memory_space<vmem>>, vector<8x32xf32>
      tpu.vector_store %arg8[%c0_38, %c0_39], %47 {strides = array<i32>} : memref<8x32xf32, #tpu.memory_space<vmem>>, vector<8x32xf32>,
    } else {
    }
    %c0 = arith.constant 0 : index
    %c0_1 = arith.constant 0 : index
    %3 = vector.load %arg8[%c0, %c0_1] : memref<8x32xf32, #tpu.memory_space<vmem>>, vector<8x32xf32>
    %c0_2 = arith.constant 0 : index
    %c0_3 = arith.constant 0 : index
    %c0_4 = arith.constant 0 : index
    %4 = vector.load %arg5[%c0_2, %c0_3, %c0_4] : memref<1x16x32xf32, #tpu.memory_space<vmem>>, vector<1x16x32xf32>
    %5 = vector.shape_cast %4 : vector<1x16x32xf32> to vector<16x32xf32>
    %cst = arith.constant dense<0.000000e+00> : vector<8x16xf32>
    %6 = tpu.matmul %3, %5, %cst {dimension_numbers = #tpu.dot_dimension_numbers<[1], [1], [0], [0], [0, 0, 1, 0], [], []>, precision = #tpu.contract_precision<fp32>} : vector<8x32xf32>, vector<16x32xf32>, vector<8x16xf32> -> vector<8x16xf32>
    %c0_5 = arith.constant 0 : index
    %c0_6 = arith.constant 0 : index
    %7 = vector.load %arg9[%c0_5, %c0_6] : memref<8x128xf32, #tpu.memory_space<vmem>>, vector<8x128xf32>
    %c0_7 = arith.constant 0 : index
    %c0_8 = arith.constant 0 : index
    %8 = vector.load %arg10[%c0_7, %c0_8] : memref<8x128xf32, #tpu.memory_space<vmem>>, vector<8x128xf32>
    %cst_9 = arith.constant dense<0xFF800000> : vector<8xf32>
    %9 = vector.multi_reduction <maximumf>, %6, %cst_9 [1] : vector<8x16xf32> to vector<8xf32>
    %10 = vector.shape_cast %9 : vector<8xf32> to vector<8x1xf32>
    %11 = vector.broadcast %10 : vector<8x1xf32> to vector<8x128xf32>
    %12 = arith.maximumf %7, %11 : vector<8x128xf32>
    %13 = arith.subf %7, %12 : vector<8x128xf32>
    %14 = math.exp2 %13 : vector<8x128xf32>
    %15 = vector.extract_strided_slice %12 {offsets = [0, 0], sizes = [8, 1], strides = [1, 1]} : vector<8x128xf32> to vector<8x1xf32>
    %16 = vector.broadcast %15 : vector<8x1xf32> to vector<8x16xf32>
    %17 = arith.subf %6, %16 : vector<8x16xf32>
    %18 = math.exp2 %17 : vector<8x16xf32>
    %19 = arith.mulf %14, %8 : vector<8x128xf32>
    %cst_10 = arith.constant dense<0.000000e+00> : vector<8xf32>
    %20 = vector.multi_reduction <add>, %18, %cst_10 [1] : vector<8x16xf32> to vector<8xf32>
    %21 = vector.shape_cast %20 : vector<8xf32> to vector<8x1xf32>
    %22 = vector.broadcast %21 : vector<8x1xf32> to vector<8x128xf32>
    %23 = arith.addf %19, %22 : vector<8x128xf32>
    %c0_11 = arith.constant 0 : index
    %c0_12 = arith.constant 0 : index
    %24 = vector.load %arg10[%c0_11, %c0_12] : memref<8x128xf32, #tpu.memory_space<vmem>>, vector<8x128xf32>
    tpu.vector_store %arg10[%c0_11, %c0_12], %23 {strides = array<i32>} : memref<8x128xf32, #tpu.memory_space<vmem>>, vector<8x128xf32>,
    %c0_13 = arith.constant 0 : index
    %c0_14 = arith.constant 0 : index
    %25 = vector.load %arg9[%c0_13, %c0_14] : memref<8x128xf32, #tpu.memory_space<vmem>>, vector<8x128xf32>
    tpu.vector_store %arg9[%c0_13, %c0_14], %12 {strides = array<i32>} : memref<8x128xf32, #tpu.memory_space<vmem>>, vector<8x128xf32>,
    %c0_15 = arith.constant 0 : index
    %c0_16 = arith.constant 0 : index
    %c0_17 = arith.constant 0 : index
    %26 = vector.load %arg6[%c0_15, %c0_16, %c0_17] : memref<1x16x32xf32, #tpu.memory_space<vmem>>, vector<1x16x32xf32>
    %27 = vector.shape_cast %26 : vector<1x16x32xf32> to vector<16x32xf32>
    %cst_18 = arith.constant dense<0.000000e+00> : vector<8x32xf32>
    %28 = tpu.matmul %18, %27, %cst_18 {dimension_numbers = #tpu.dot_dimension_numbers<[1], [0], [0], [1], [0, 0, 1, 1], [], []>, precision = #tpu.contract_precision<fp32>} : vector<8x16xf32>, vector<16x32xf32>, vector<8x32xf32> -> vector<8x32xf32>
    %c0_19 = arith.constant 0 : index
    %c0_20 = arith.constant 0 : index
    %29 = vector.load %arg11[%c0_19, %c0_20] : memref<8x32xf32, #tpu.memory_space<vmem>>, vector<8x32xf32>
    %30 = vector.extract_strided_slice %14 {offsets = [0, 0], sizes = [8, 1], strides = [1, 1]} : vector<8x128xf32> to vector<8x1xf32>
    %31 = vector.broadcast %30 : vector<8x1xf32> to vector<8x32xf32>
    %32 = arith.mulf %29, %31 : vector<8x32xf32>
    %33 = arith.addf %32, %28 : vector<8x32xf32>
    %c0_21 = arith.constant 0 : index
    %c0_22 = arith.constant 0 : index
    %34 = vector.load %arg11[%c0_21, %c0_22] : memref<8x32xf32, #tpu.memory_space<vmem>>, vector<8x32xf32>
    tpu.vector_store %arg11[%c0_21, %c0_22], %33 {strides = array<i32>} : memref<8x32xf32, #tpu.memory_space<vmem>>, vector<8x32xf32>,
    %c0_i32_23 = arith.constant 0 : i32
    %35 = arith.cmpi eq, %arg2, %c0_i32_23 : i32
    %36 = arith.extui %35 : i1 to i32
    %c0_i32_24 = arith.constant 0 : i32
    %37 = arith.cmpi ne, %36, %c0_i32_24 : i32
    scf.if %37 {
      %c0_25 = arith.constant 0 : index
      %c0_26 = arith.constant 0 : index
      %38 = vector.load %arg10[%c0_25, %c0_26] : memref<8x128xf32, #tpu.memory_space<vmem>>, vector<8x128xf32>
      %cst_27 = arith.constant 1.000000e+00 : f32
      %39 = vector.broadcast %cst_27 : f32 to vector<8x128xf32>
      %40 = arith.divf %39, %38 : vector<8x128xf32>
      %c0_28 = arith.constant 0 : index
      %c0_29 = arith.constant 0 : index
      %41 = vector.load %arg11[%c0_28, %c0_29] : memref<8x32xf32, #tpu.memory_space<vmem>>, vector<8x32xf32>
      %42 = vector.extract_strided_slice %40 {offsets = [0, 0], sizes = [8, 1], strides = [1, 1]} : vector<8x128xf32> to vector<8x1xf32>
      %43 = vector.broadcast %42 : vector<8x1xf32> to vector<8x32xf32>
      %44 = arith.mulf %41, %43 : vector<8x32xf32>
      %c0_30 = arith.constant 0 : index
      %c0_31 = arith.constant 0 : index
      %c0_32 = arith.constant 0 : index
      %45 = vector.load %arg7[%c0_30, %c0_31, %c0_32] : memref<1x8x32xf32, #tpu.memory_space<vmem>>, vector<1x8x32xf32>
      %46 = vector.shape_cast %45 : vector<1x8x32xf32> to vector<8x32xf32>
      %47 = vector.shape_cast %44 : vector<8x32xf32> to vector<1x8x32xf32>
      tpu.vector_store %arg7[%c0_30, %c0_31, %c0_32], %47 {strides = array<i32>} : memref<1x8x32xf32, #tpu.memory_space<vmem>>, vector<1x8x32xf32>,
    } else {
    }
    return
  }
  func.func @transform_0(%arg0: i32, %arg1: i32, %arg2: i32, %arg3: memref<1xi32, #tpu.memory_space<smem>>) -> (i32, i32, i32) {
    %c0_i32 = arith.constant 0 : i32
    %c0_i32_0 = arith.constant 0 : i32
    return %arg0, %arg1, %c0_i32 : i32, i32, i32
  }
  func.func @transform_1(%arg0: i32, %arg1: i32, %arg2: i32, %arg3: memref<1xi32, #tpu.memory_space<smem>>) -> (i32, i32, i32) {
    %c0_i32 = arith.constant 0 : i32
    %c0_i32_0 = arith.constant 0 : i32
    return %arg0, %arg2, %c0_i32 : i32, i32, i32
  }
  func.func @transform_2(%arg0: i32, %arg1: i32, %arg2: i32, %arg3: memref<1xi32, #tpu.memory_space<smem>>) -> (i32, i32, i32) {
    %c0_i32 = arith.constant 0 : i32
    %c0_i32_0 = arith.constant 0 : i32
    return %arg0, %arg2, %c0_i32 : i32, i32, i32
  }
  func.func @transform_3(%arg0: i32, %arg1: i32, %arg2: i32, %arg3: memref<1xi32, #tpu.memory_space<smem>>) -> (i32, i32, i32) {
    %c0_i32 = arith.constant 0 : i32
    %c0_i32_0 = arith.constant 0 : i32
    return %arg0, %arg1, %c0_i32 : i32, i32, i32
  }
}

</mosaic_0001>

<bundles_post_ra>
// kernel: tpu_custom_call.1
= control target key start
LH: loop header
LB: loop body
LE: loop exit
PB: predicated region body
PF: predicated region fallthrough
CT: control target
= control target key end

     0   :  { %s2133_s0 = inlined_call_operand.<no memory space> [shape: s32[1], index: 0, kind: input, shape index: {}]   ;;  %s2134_s1 = inlined_call_operand.hbm [shape: f32[2,8,32], index: 1, kind: input, shape index: {}]   ;;  %s2135_s2 = inlined_call_operand.hbm [shape: f32[2,16,32], index: 2, kind: input, shape index: {}]   ;;  %s2136_s3 = inlined_call_operand.hbm [shape: f32[2,16,32], index: 3, kind: input, shape index: {}]   ;;  %s2137_s4 = inlined_call_operand.hbm [shape: f32[2,8,32], index: 4, kind: output, shape index: {}]  }
   0x1   :  { %2141 = sst [smem:[#allocation21_spill]] %s2135_s2 }
   0x2   :  { %10 = vsyncpa [#allocation9], 0 }
   0x3   :  { %12 = vsyncpa [#allocation9 + $0x1], 0 }
   0x4   :  { %13 = vsyncpa [#allocation12], 0 }
   0x5   :  { %15 = vsyncpa [#allocation12 + $0x1], 0 }
   0x6   :  { %16 = vsyncpa [#allocation10], 0 }
   0x7   :  { %18 = vsyncpa [#allocation10 + $0x1], 0  ;;  %s1871_s15 = smov 0   ;;  %s1873_s0 = smov 0  }
   0x8   :  { %s1875_s16 = smov 0   ;;  %s1877_s17 = smov 0  }
   0x9   :  { %s1879_s18 = smov 0   ;;  %s1881_s19 = smov 0  }
   0xa LB: > { %2142 = sst [smem:[#allocation18_spill]] %s1823_s16  ;;  %s1902_s20 = sadd.s32 4294967295, %s1835_s19   ;;  %s1835_s19 = sphi %s1881_s19, %s24_s19   ;;  %s1831_s18 = sphi %s1879_s18, %s2160_s18   ;;  %s1827_s17 = sphi %s1877_s17, %s2159_s17   ;;  %s1823_s16 = sphi %s1875_s16, %s2155_s16   ;;  %s1819_s0 = sphi %s1873_s0, %s2158_s0   ;;  %s1815_s15 = sphi %s1871_s15, %s2157_s15  }
   0xb   : > { %s1440_s21 = sadd.s32 4294967294, %s1835_s19   ;;  %s43_s22 = sadd.s32 1, %s1831_s18 }
   0xc   : > { %s52_s23 = sadd.s32 1, %s1823_s16  ;;  %p45_p0 = scmp.ge.s32.totalorder %s43_s22, 2 }
   0xd   : > { %p59_p1 = scmp.ne.s32.totalorder %s1823_s16, %s1819_s0  ;;  %p60_p2 = scmp.eq.s32.totalorder %s1835_s19, 0 }
   0xe   : > { %p65_p3 = scmp.ne.s32.totalorder %s1819_s0, %s1815_s15  ;;  %s2162_s22 = smov (%p45_p0, %s43_s22), 0 }
   0xf   : > { %2143 = sst [smem:[#allocation19_spill]] %s2162_s22  ;;  %p1914_p4 = por %p60_p2, %p59_p1 }
  0x10   : > { %p66_p5 = scmp.eq.s32.totalorder %s1902_s20, 0  ;;  %s47_s25 = ssub.s32 %s1831_s18, %s2162_s22 }
  0x11   : > { %p147_p6 = scmp.eq.s32.totalorder %s1902_s20, 1  ;;  %p50_p7 = scmp.eq.s32.totalorder %s47_s25, 0 }
  0x12   : > { %p1922_p8 = por %p66_p5, %p65_p3  ;;  %p153_p10 = scmp.eq.s32.totalorder %s1440_s21, 1 }
  0x13   : > { %p1926_p9 = por %p147_p6, %p59_p1  ;;  %p1604_p13 = scmp.lt.s32.totalorder %s1835_s19, 2 }
  0x14   : > { %s1931_s28 = scalar_select %p50_p7, %s1823_s16, %s52_s23  }
  0x15   : > { %p1933_p11 = por %p153_p10, %p65_p3  ;;  %s1940_s30 = sand.u32 1, %s1823_s16  }
  0x16   : > { %2147 = sst [smem:[#allocation20_spill]] %s1931_s28  ;;  %s192_s5 = sand.u32 1, %s1835_s19  }
  0x17   : > { %s1445_s6 = sshll.u32 %s1940_s30, 4  ;;  %p1946_p0 = pnand %p1604_p13, %p1914_p4 }
  0x18   : > { %s1460_s8 = sshll.u32 %s1831_s18, 8  ;;  %s2150_s2 = sld [smem:[#allocation21_spill]] }
  0x19   : > { %s196_s12 = scalar_lea.vmem [#allocation11], %s1445_s6  ;;  %s1956_s14 = scalar_lea.sflag [#allocation12], %s192_s5 }
  0x1a   : > { %s205_s13 = sshll.u32 %s196_s12, 4  ;;  %p1669_p1 = pneg %p1946_p0  ;;  %s206_s13 = int_to_ptr.vmem [resolvable:$true] %s205_s13 }
  0x1b   : > { %s1680_s21 = scalar_lea.vmem %s206_s13, 256  ;;  %s1837_s23 = smov [#allocation11]  }
  0x1c   : > { %p1681_p2 = scmp.ne.s32.totalorder %s206_s13, %s1680_s21  ;;  %s1685_s24 = sshll.u32 %s1837_s23, 4  ;;  %s1686_s24 = int_to_ptr.vmem [resolvable:$false] %s1685_s24 }
  0x1d   : > { %s1687_s25 = scalar_lea.vmem %s1686_s24, 512  ;;  %p1688_p5 = scmp.lt.s32.totalorder %s206_s13, %s1686_s24 }
  0x1e   : > { %s204_s11 = scalar_lea.hbm %s2150_s2, %s1460_s8  ;;  %p1683_p3 = pnand %p1681_p2, %p1669_p1 }
  0x1f   : > { %p1689_p6 = scmp.lt.s32.totalorder %s1687_s25, %s1680_s21 }
  0x20   : > { %p1684_p4 = pneg %p1683_p3 }
  0x21   : > { %p1690_p7 = por %p1689_p6, %p1688_p5 }
  0x23   : > { %p1691_p10 = pnand %p1690_p7, %p1684_p4 }
  0x25   : > { %1694 = shalt.err (!%p1691_p10)
}
  0x26   : > { %s2140_s9 = smov 128   ;;  %s1839_s5 = smov 8  }
  0x27   : > { %1596 = dma.hbm_to_vmem [thread:$0]  (!%p1946_p0), %s204_s11, 256, %s206_s13, %s1956_s14, %s2140_s9, %s2140_s9, %s1839_s5  }
  0x28   : > { %s1972_s21 = scalar_lea.hbm %s2136_s3, %s1460_s8  ;;  %p1451_p13 = scmp.ge.s32.totalorder %s1835_s19, 1 }
  0x29   : > { %s219_s23 = scalar_lea.vmem [#allocation13], %s1445_s6  ;;  %p236_p2 = scmp.lt.s32.totalorder %s1835_s19, 3 }
  0x2a   : > { %s228_s24 = sshll.u32 %s219_s23, 4  ;;  %s1443_s2 = sshll.u32 %s1940_s30, 3  ;;  %s1987_s24 = int_to_ptr.vmem [resolvable:$true] %s228_s24 }
  0x2b   : > { %p1978_p3 = pnand %p1451_p13, %p236_p2  ;;  %s1444_s22 = sshll.u32 %s1831_s18, 7 }
  0x2c   : > { %s183_s11 = scalar_lea.hbm %s2134_s1, %s1444_s22  ;;  %s177_s8 = scalar_lea.vmem [#allocation8], %s1443_s2 }
  0x2d   : > { %s185_s13 = sshll.u32 %s177_s8, 4  ;;  %s174_s10 = scalar_lea.sflag [#allocation9], %s1940_s30  ;;  %s186_s13 = int_to_ptr.vmem [resolvable:$true] %s185_s13 }
  0x2e   : > { %s1708_s12 = scalar_lea.vmem %s186_s13, 128  ;;  %s1840_s6 = smov [#allocation8]  }
  0x2f   : > { %p1709_p4 = scmp.ne.s32.totalorder %s186_s13, %s1708_s12  ;;  %s1713_s23 = sshll.u32 %s1840_s6, 4  ;;  %s1714_s23 = int_to_ptr.vmem [resolvable:$false] %s1713_s23 }
  0x30   : > { %s1715_s9 = scalar_lea.vmem %s1714_s23, 256  ;;  %p1716_p7 = scmp.lt.s32.totalorder %s186_s13, %s1714_s23 }
  0x31   : > { %p1711_p5 = pnand %p1709_p4, %p1669_p1  ;;  %p1717_p10 = scmp.lt.s32.totalorder %s1715_s9, %s1708_s12 }
  0x33   : > { %p1712_p6 = pneg %p1711_p5  ;;  %p1718_p13 = por %p1717_p10, %p1716_p7 }
  0x35   : > { %p1719_p2 = pnand %p1718_p13, %p1712_p6 }
  0x37   : > { %1722 = shalt.err (!%p1719_p2)
}
  0x38   : > { %1593 = dma.hbm_to_vmem [thread:$0]  (!%p1946_p0), %s183_s11, 128, %s186_s13, %s174_s10  }
  0x39   : > { %s1736_s2 = scalar_lea.vmem %s1987_s24, 256  ;;  %s1841_s16 = smov [#allocation13]  }
  0x3a   : > { %p1737_p12 = scmp.ne.s32.totalorder %s1987_s24, %s1736_s2  ;;  %s1741_s22 = sshll.u32 %s1841_s16, 4  ;;  %s1742_s22 = int_to_ptr.vmem [resolvable:$false] %s1741_s22 }
  0x3b   : > { %s1743_s28 = scalar_lea.vmem %s1742_s22, 512  ;;  %p1744_p7 = scmp.lt.s32.totalorder %s1987_s24, %s1742_s22 }
  0x3c   : > { %p1739_p4 = pnand %p1737_p12, %p1669_p1  ;;  %p1745_p6 = scmp.lt.s32.totalorder %s1743_s28, %s1736_s2 }
  0x3e   : > { %p1740_p5 = pneg %p1739_p4  ;;  %p1746_p10 = por %p1745_p6, %p1744_p7 }
  0x40   : > { %p1747_p13 = pnand %p1746_p10, %p1740_p5 }
  0x42   : > { %1750 = shalt.err (!%p1747_p13)
}
  0x43   : > { %s2152_s30 = smov 128   ;;  %240 = sbr.rel (%p1978_p3) target bundleno = 884 (0x374), region = 32 }
  0x44   : > { %1599 = dma.hbm_to_vmem [thread:$0]  (!%p1946_p0), %s1972_s21, 256, %s1987_s24, %s1956_s14, %s2152_s30, %s2152_s30, %s1839_s5  }
  0x45   : > { %s2012_s9 = sand.u32 (!%p1978_p3), 1, %s1819_s0  }
  0x46   : > { %s1452_s11 = sshll.u32 (!%p1978_p3), %s2012_s9, 3  ;;  %s243_s8 = scalar_lea.sflag (!%p1978_p3), [#allocation9], %s2012_s9 }
  0x47   : > { %s246_s7 = scalar_lea.vmem (!%p1978_p3), [#allocation8], %s1452_s11 }
  0x48   : > { %1802 = dma.done.wait (%p1922_p8), %s243_s8, 128  }
  0x49   : > { %1804 = vsyncadd (%p1922_p8), %s243_s8, 4294967168  ;;  %s251_s14 = sand.u32 1, %s1902_s20   ;;  %s1453_s5 = sshll.u32 %s2012_s9, 4 }
  0x4a   : > { %s252_s21 = scalar_lea.sflag [#allocation12], %s251_s14  ;;  %s255_s24 = scalar_lea.vmem [#allocation11], %s1453_s5 }
  0x4b   : > { %1806 = dma.done.wait (%p1922_p8), %s252_s21, 512  }
  0x4c   : > { %1808 = vsyncadd (%p1922_p8), %s252_s21, 4294966784  ;;  %vm305_vm0 = vcmask 261120   ;;  %v1842_v0 = vmov 0.0   ;;  %vm1843_vm1 = vmmov 0   ;;  %v307_v1 = vld [vmem:[%s246_s7] sm:$0xff]  ;;  %v311_v3 = vld [vmem:[%s255_s24] sm:$0xff] }
  0x4d   : > { %1498 = vmatprep.subr.mxu0 %v1842_v0  ;;  %1505 = vmatprep.subr.mxu1 %v1842_v0  ;;  %306 = vst.msk [vmem:[#allocation5] sm:$0xff] %vm305_vm0, %v1842_v0  ;;  %v312_v2 = vld [vmem:[%s255_s24 + $0x8] sm:$0xff]  ;;  %v308_v4 = vmul.f32 23.08312, %v307_v1  ;;  %v318_v6 = vsel %vm305_vm0, %v311_v3, 0  ;;  %v1844_v24 = vmov 0  }
  0x4e   : > { %1502 = vmatprep.mubr.msk.f32.mxu0 %vm1843_vm1, %v1842_v0  ;;  %1509 = vmatprep.mubr.msk.f32.mxu1 %vm1843_vm1, %v1842_v0  ;;  %v321_v5 = vsel %vm305_vm0, %v312_v2, 0  ;;  %v355_v8 = vand.u32 4294901760, %v318_v6  ;;  %vm784_vm2 = vcmask 130048   ;;  %s264_s20 = scalar_lea.vmem [#allocation13], %s1453_s5  ;;  %s1457_s26 = sshll.u32 %s1827_s17, 7 }
  0x4f   : > { %v352_v7 = vand.u32 4294901760, %v321_v5  ;;  %309 = vst.msk [vmem:[#allocation2] sm:$0xff] %vm305_vm0, %v308_v4  ;;  %1659 = vset.pattern.permute.xlu0 %v1844_v24  ;;  %1660 = vset.pattern.permute.xlu1 %v1844_v24  ;;  %v806_v44 = vld [vmem:[%s264_s20 + $0x8] sm:$0xff]  ;;  %v805_v47 = vld [vmem:[%s264_s20] sm:$0xff]  ;;  %s296_s25 = scalar_lea.vmem [#allocation14], %s1452_s11  ;;  %s1305_s6 = scalar_lea.hbm %s2137_s4, %s1457_s26 }
  0x50   : > { %v437_v10 = vsub.f32 %v318_v6, %v355_v8  ;;  %v839_v45 = vand.u32 4294901760, %v806_v44  ;;  %v842_v49 = vand.u32 4294901760, %v805_v47  ;;  %s1307_s13 = sshll.u32 %s296_s25, 4  ;;  %s1293_s23 = scalar_lea.sflag [#allocation10], %s2012_s9  ;;  %s1308_s13 = int_to_ptr.vmem [resolvable:$true] %s1307_s13 }
  0x51   : > { %1499 = vmatpush3.xpose.msra.mxu0 %v352_v7  ;;  %v430_v9 = vsub.f32 %v321_v5, %v352_v7  ;;  %s1751_s2 = scalar_lea.vmem %s1308_s13, 128  ;;  %s1845_s17 = smov [#allocation14]  }
  0x52   : > { %1500 = vmatprep.subr.mxu0 %v1842_v0  ;;  %v438_v12 = vand.u32 4294901760, %v437_v10  ;;  %v917_v46 = vsub.f32 %v806_v44, %v839_v45  ;;  %v924_v51 = vsub.f32 %v805_v47, %v842_v49  ;;  %p1752_p8 = scmp.ne.s32.totalorder %s1308_s13, %s1751_s2  ;;  %s1755_s16 = sshll.u32 %s1845_s17, 4  ;;  %s1756_s16 = int_to_ptr.vmem [resolvable:$false] %s1755_s16 }
  0x53   : > { %v431_v11 = vand.u32 4294901760, %v430_v9  ;;  %s1757_s22 = scalar_lea.vmem %s1756_s16, 256  ;;  %p1758_p1 = scmp.lt.s32.totalorder %s1308_s13, %s1756_s16 }
  0x54   : > { %v439_v14 = vsub.f32 %v437_v10, %v438_v12  ;;  %v918_v48 = vand.u32 4294901760, %v917_v46  ;;  %v925_v53 = vand.u32 4294901760, %v924_v51  ;;  %p1753_p12 = pnand %p1752_p8, %p1926_p9  ;;  %p1759_p3 = scmp.lt.s32.totalorder %s1757_s22, %s1751_s2 }
  0x55   : > { %v432_v13 = vsub.f32 %v430_v9, %v431_v11  ;;  %1501 = vmatpush3.xpose.msra.mxu0 %v355_v8 }
  0x56   : > { %1512 = vmatprep.subr.mxu0 %v1842_v0  ;;  %v310_v16 = vld [vmem:[#allocation2] sm:$0xff]  ;;  %v440_v18 = vand.u32 4294901760, %v439_v14  ;;  %v919_v50 = vsub.f32 %v917_v46, %v918_v48  ;;  %v926_v54 = vsub.f32 %v924_v51, %v925_v53  ;;  %p1754_p0 = pneg %p1753_p12  ;;  %p1760_p2 = por %p1759_p3, %p1758_p1 }
  0x57   : > { %v433_v15 = vand.u32 4294901760, %v432_v13  ;;  %v315_v17 = vsel %vm305_vm0, %v310_v16, 0 }
  0x58   : > { %v390_v19 = vand.u32 4294901760, %v315_v17  ;;  %v920_v52 = vand.u32 4294901760, %v919_v50  ;;  %v927_v55 = vand.u32 4294901760, %v926_v54  ;;  %p1761_p4 = pnand %p1760_p2, %p1754_p0 }
  0x59   : > { %1506 = vmatpush3.xpose.msra.mxu1 %v433_v15 }
  0x5a   : > { %1507 = vmatprep.subr.mxu1 %v1842_v0  ;;  %v391_v20 = vsub.f32 %v315_v17, %v390_v19 }
  0x5c   : > { %v392_v21 = vand.u32 4294901760, %v391_v20 }
  0x5d   : > { %1508 = vmatpush3.xpose.msra.mxu1 %v440_v18 }
  0x5e   : > { %1519 = vmatprep.subr.mxu1 %v1842_v0  ;;  %v393_v22 = vsub.f32 %v391_v20, %v392_v21 }
  0x60   : > { %1510 = vmatmul.mubr.f32.vlgmr.msra.gmra.mxu1 %v390_v19  ;;  %v394_v23 = vand.u32 4294901760, %v393_v22  ;;  %v1269_v22 = vld [vmem:[#allocation5] sm:$0xff] }
  0x61   : > { %1520 = vmatpush3.xpose.msra.mxu1 %v352_v7  ;;  %1523 = vmatprep.mubr.msk.f32.mxu1 %vm1843_vm1, %v1842_v0 }
  0x62   : > { %1521 = vmatprep.subr.mxu1 %v1842_v0  ;;  %1503 = vmatmul.mubr.f32.vlgmr.msra.gmra.mxu0 %v394_v23 }
  0x63   : > { %1513 = vmatpush3.xpose.msra.mxu0 %v430_v9  ;;  %1516 = vmatprep.mubr.msk.f32.mxu0 %vm1843_vm1, %v1842_v0 }
  0x64   : > { %1514 = vmatprep.subr.mxu0 %v1842_v0 }
  0x65   : > { %1522 = vmatpush3.xpose.msra.mxu1 %v355_v8 }
  0x66   : > { %1533 = vmatprep.subr.mxu1 %v1842_v0 }
  0x67   : > { %1515 = vmatpush3.xpose.msra.mxu0 %v437_v10 }
  0x68   : > { %1524 = vmatmul.mubr.f32.vlgmr.msra.gmra.mxu1 %v392_v21  ;;  %1526 = vmatprep.subr.mxu0 %v1842_v0 }
  0x69   : > { %1534 = vmatpush3.xpose.msra.mxu1 %v352_v7  ;;  %1537 = vmatprep.mubr.msk.f32.mxu1 %vm1843_vm1, %v1842_v0 }
  0x6a   : > { %1535 = vmatprep.subr.mxu1 %v1842_v0  ;;  %1517 = vmatmul.mubr.f32.vlgmr.msra.gmra.mxu0 %v391_v20 }
  0x6b   : > { %1527 = vmatpush3.xpose.msra.mxu0 %v431_v11  ;;  %1530 = vmatprep.mubr.msk.f32.mxu0 %vm1843_vm1, %v1842_v0 }
  0x6c   : > { %1528 = vmatprep.subr.mxu0 %v1842_v0 }
  0x6d   : > { %1536 = vmatpush3.xpose.msra.mxu1 %v355_v8 }
  0x6e   : > { %1547 = vmatprep.subr.mxu1 %v1842_v0 }
  0x6f   : > { %1529 = vmatpush3.xpose.msra.mxu0 %v438_v12 }
  0x70   : > { %1538 = vmatmul.mubr.f32.vlgmr.msra.gmra.mxu1 %v390_v19  ;;  %1540 = vmatprep.subr.mxu0 %v1842_v0 }
  0x71   : > { %1551 = vmatprep.mubr.msk.f32.mxu1 %vm1843_vm1, %v1842_v0  ;;  %1548 = vmatpush3.msra.mxu1 %v920_v52 }
  0x72   : > { %1531 = vmatmul.mubr.f32.vlgmr.msra.gmra.mxu0 %v390_v19  ;;  %1549 = vmatprep.subr.mxu1 %v1842_v0 }
  0x73   : > { %1544 = vmatprep.mubr.msk.f32.mxu0 %vm1843_vm1, %v1842_v0  ;;  %1541 = vmatpush3.msra.mxu0 %v839_v45 }
  0x74   : > { %1542 = vmatprep.subr.mxu0 %v1842_v0  ;;  %1550 = vmatpush3.msra.mxu1 %v927_v55 }
  0x75   : > { %1543 = vmatpush3.msra.mxu0 %v842_v49  ;;  %1561 = vmatprep.subr.mxu1 %v1842_v0 }
  0x76   : > { %1554 = vmatprep.subr.mxu0 %v1842_v0 }
 0x120   : > { %v477_v25 = vpop.f32.mrf.mxu1 }
 0x122   : > { %v1511_v26 = vpop.f32.mrf.mxu1  ;;  %v396_v27 = vpop.f32.mrf.mxu0 }
 0x123   : > { %v478_v32 = vadd.f32 %v477_v25, %v396_v27 }
 0x124   : > { %v1504_v28 = vpop.f32.mrf.mxu0 }
 0x128   : > { %v628_v29 = vpop.f32.mrf.mxu1 }
 0x12a   : > { %v1525_v30 = vpop.f32.mrf.mxu1  ;;  %v553_v31 = vpop.f32.mrf.mxu0 }
 0x12b   : > { %v554_v34 = vadd.f32 %v553_v31, %v478_v32 }
 0x12c   : > { %v1518_v33 = vpop.f32.mrf.mxu0 }
 0x12d   : > { %v629_v36 = vadd.f32 %v628_v29, %v554_v34 }
 0x130   : > { %v778_v35 = vpop.f32.mrf.mxu1 }
 0x132   : > { %v1539_v37 = vpop.f32.mrf.mxu1  ;;  %v705_v38 = vpop.f32.mrf.mxu0 }
 0x133   : > { %v706_v39 = vadd.f32 %v705_v38, %v629_v36 }
 0x134   : > { %v1532_v40 = vpop.f32.mrf.mxu0 }
 0x135   : > { %v779_v41 = vadd.f32 %v778_v35, %v706_v39 }
 0x137   : > { %v785_v42 = vsel %vm784_vm2, %v779_v41, -inf }
 0x138   : > { %786 = vmax.xlane.f32.xlu0 %v785_v42 }
 0x1c1   : > { %v787_v43 = vpop.xlane.xlu0 %786 }
 0x1c2   : > { %793 = vperm.xlu0 %1659, %v787_v43   ;;  %v789_v59 = vsub.f32 -inf, %v787_v43 }
 0x23d   : > { %v794_v56 = vpop.permute.xlu0 %793 }
 0x23e   : > { %v796_v57 = vsub.f32 %v779_v41, %v794_v56 }
 0x240   : > { %1661 = vpow2.f32 %v796_v57 }
 0x241   : > { %1663 = vpow2.f32 %v789_v59 }
 0x24d   : > { %v1662_v58 = vpop.eup %1661 }
 0x24e   : > { %v799_v60 = vsel %vm784_vm2, %v1662_v58, 0.0  ;;  %v808_v61 = vsel %vm784_vm2, %v1662_v58, 0  ;;  %v1664_v4 = vpop.eup %1663 }
 0x24f   : > { %800 = vadd.xlane.f32.xlu1 %v799_v60  ;;  %v877_v62 = vand.u32 4294901760, %v808_v61  ;;  %v798_v5 = vmul.f32 0.0, %v1664_v4 }
 0x251   : > { %v878_v63 = vsub.f32 %v808_v61, %v877_v62  ;;  %1552 = vmatmul.mubr.f32.vlgmr.msra.gmra.mxu1 %v877_v62 }
 0x252   : > { %1562 = vmatpush3.msra.mxu1 %v839_v45  ;;  %1565 = vmatprep.mubr.msk.f32.mxu1 %vm1843_vm1, %v1842_v0 }
 0x253   : > { %1563 = vmatprep.subr.mxu1 %v1842_v0  ;;  %v879_v1 = vand.u32 4294901760, %v878_v63 }
 0x254   : > { %1564 = vmatpush3.msra.mxu1 %v842_v49 }
 0x255   : > { %1566 = vmatmul.mubr.f32.vlgmr.msra.gmra.mxu1 %v879_v1  ;;  %1575 = vmatprep.subr.mxu1 %v1842_v0  ;;  %v880_v2 = vsub.f32 %v878_v63, %v879_v1 }
 0x256   : > { %1576 = vmatpush3.msra.mxu1 %v839_v45  ;;  %1579 = vmatprep.mubr.msk.f32.mxu1 %vm1843_vm1, %v1842_v0 }
 0x257   : > { %1577 = vmatprep.subr.mxu1 %v1842_v0  ;;  %v881_v3 = vand.u32 4294901760, %v880_v2 }
 0x258   : > { %1578 = vmatpush3.msra.mxu1 %v842_v49 }
 0x259   : > { %1545 = vmatmul.mubr.f32.vlgmr.msra.gmra.mxu0 %v881_v3  ;;  %1580 = vmatmul.mubr.f32.vlgmr.msra.gmra.mxu1 %v877_v62 }
 0x25a   : > { %1555 = vmatpush3.msra.mxu0 %v917_v46  ;;  %1558 = vmatprep.mubr.msk.f32.mxu0 %vm1843_vm1, %v1842_v0 }
 0x25b   : > { %1556 = vmatprep.subr.mxu0 %v1842_v0 }
 0x25c   : > { %1557 = vmatpush3.msra.mxu0 %v924_v51 }
 0x25d   : > { %1559 = vmatmul.mubr.f32.vlgmr.msra.gmra.mxu0 %v878_v63  ;;  %1568 = vmatprep.subr.mxu0 %v1842_v0 }
 0x25e   : > { %1569 = vmatpush3.msra.mxu0 %v918_v48  ;;  %1572 = vmatprep.mubr.msk.f32.mxu0 %vm1843_vm1, %v1842_v0 }
 0x25f   : > { %1570 = vmatprep.subr.mxu0 %v1842_v0 }
 0x260   : > { %1571 = vmatpush3.msra.mxu0 %v925_v53  ;;  %1272 = vperm.xlu1 %1660, %v1664_v4  }
 0x261   : > { %1573 = vmatmul.mubr.f32.vlgmr.msra.gmra.mxu0 %v877_v62 }
 0x2d8   : > { %v801_v6 = vpop.xlane.xlu1 %800 }
 0x2d9   : > { %v802_v7 = vadd.f32 %v801_v6, %v798_v5 }
 0x2db   : > { %1665 = vrcp.f32 %v802_v7 }
 0x2dc   : > { %v1273_v21 = vpop.permute.xlu1 %1272 }
 0x2dd   : > { %v1275_v26 = vmul.f32 %v1273_v21, %v1269_v22 }
 0x2e8   : > { %v1666_v8 = vpop.eup %1665 }
 0x2e9   : > { %1287 = vperm.xlu1 %1660, %v1666_v8  }
 0x311   : > { %v964_v9 = vpop.f32.mrf.mxu1 }
 0x313   : > { %v1553_v10 = vpop.f32.mrf.mxu1 }
 0x315   : > { %v1115_v11 = vpop.f32.mrf.mxu1 }
 0x317   : > { %v1567_v12 = vpop.f32.mrf.mxu1 }
 0x319   : > { %v883_v13 = vpop.f32.mrf.mxu0  ;;  %v1265_v14 = vpop.f32.mrf.mxu1 }
 0x31a   : > { %v965_v0 = vadd.f32 %v964_v9, %v883_v13 }
 0x31b   : > { %v1546_v15 = vpop.f32.mrf.mxu0  ;;  %v1581_v16 = vpop.f32.mrf.mxu1 }
 0x31d   : > { %v1040_v17 = vpop.f32.mrf.mxu0 }
 0x31e   : > { %v1041_v18 = vadd.f32 %v1040_v17, %v965_v0 }
 0x31f   : > { %v1560_v19 = vpop.f32.mrf.mxu0 }
 0x320   : > { %v1116_v20 = vadd.f32 %v1115_v11, %v1041_v18 }
 0x321   : > { %v1192_v23 = vpop.f32.mrf.mxu0 }
 0x322   : > { %v1193_v24 = vadd.f32 %v1192_v23, %v1116_v20 }
 0x323   : > { %v1574_v25 = vpop.f32.mrf.mxu0 }
 0x324   : > { %v1266_v27 = vadd.f32 %v1265_v14, %v1193_v24 }
 0x326   : > { %v1276_v28 = vadd.f32 %v1275_v26, %v1266_v27 }
 0x328   : > { %1277 = vst.msk [vmem:[#allocation5] sm:$0xff] %vm305_vm0, %v1276_v28 }
 0x32f   : > { %v1284_v30 = vld [vmem:[#allocation5] sm:$0xff] }
 0x364   : > { %v1288_v29 = vpop.permute.xlu1 %1287 }
 0x365   : > { %v1290_v31 = vmul.f32 %v1288_v29, %v1284_v30 }
 0x367   : > { %1291 = vst.msk [vmem:[%s296_s25] sm:$0xff] %vm305_vm0, %v1290_v31 }
 0x368   : > { %1764 = shalt.err (!%p1761_p4)
}
 0x369   : > { %s1765_s28 = scalar_lea.hbm %s1305_s6, 128  ;;  %s1769_s11 = scalar_lea.hbm %s2137_s4, 256 }
 0x36a   : > { %p1766_p5 = scmp.ne.s32.totalorder %s1305_s6, %s1765_s28  ;;  %p1770_p10 = scmp.lt.s32.totalorder %s1305_s6, %s2137_s4 }
 0x36b   : > { %p1771_p13 = scmp.lt.s32.totalorder %s1769_s11, %s1765_s28 }
 0x36c   : > { %p1767_p7 = pnand %p1766_p5, %p1926_p9 }
 0x36d   : > { %p1772_p8 = por %p1771_p13, %p1770_p10 }
 0x36e   : > { %p1768_p6 = pneg %p1767_p7 }
 0x370   : > { %p1773_p12 = pnand %p1772_p8, %p1768_p6 }
 0x372   : > { %1776 = shalt.err (!%p1773_p12)
}
 0x373   : > { %1588 = dma.vmem_to_hbm [thread:$0]  (%p1926_p9), %s1308_s13, 128, %s1305_s6, %s1293_s23  }
 0x374 PF: > { %s1319_s14 = sand.u32 1, %s1815_s15   ;;  %p2153_p0 = scmp.ge.s32.totalorder %s1835_s19, 2 }
 0x375   : > { %s1320_s5 = scalar_lea.sflag [#allocation10], %s1319_s14 }
 0x376   : > { %p1601_p1 = pnand %p2153_p0, %p1933_p11 }
 0x378   : > { %p1602_p3 = pneg %p1601_p1 }
 0x37a   : > { %1810 = dma.done.wait (%p1602_p3), %s1320_s5, 128  }
 0x37b   : > { %1812 = vsyncadd (%p1602_p3), %s1320_s5, 4294967168  ;;  %s24_s19 = sadd.s32 1, %s1835_s19   ;;  %s2154_s21 = sld [smem:[#allocation18_spill]] }
 0x37c   : > { %p21_p2 = scmp.ge.s32.totalorder %s24_s19, 4   ;;  %s2155_s16 = sld [smem:[#allocation20_spill]] }
 0x37d   : > { %s2156_s27 = sld [smem:[#allocation19_spill]]  ;;  %s2157_s15 = smov %s1819_s0 }
 0x37e   : > { %s2159_s17 = smov %s1831_s18 }
 0x37f   :  { %23 = sbr.rel (!%p21_p2) target bundleno = 10 (0xa), region = 109 }
 0x381   : > { %s2158_s0 = smov %s2154_s21 }
 0x383   : > { %s2160_s18 = smov %s2156_s27 }
 0x384   :  { %1325 = vsyncpa [#allocation9], 1 }
 0x385   :  { %1327 = vsyncpa [#allocation9 + $0x1], 1 }
 0x386   :  { %1328 = vsyncpa [#allocation12], 1 }
 0x387   :  { %1330 = vsyncpa [#allocation12 + $0x1], 1 }
 0x388   :  { %1331 = vsyncpa [#allocation10], 1 }
 0x389   :  { %1333 = vsyncpa [#allocation10 + $0x1], 1 }

</bundles_post_ra>
